<compile_context>
chip_gen: v5e
topology: v5e:2x2
jax: 0.10.0
libtpu: 0.0.40
codegen_flags: <defaults>
</compile_context>

<pallas_src>
from typing import NamedTuple

import jax
import jax.numpy as jnp
from jax.experimental import pallas as pl
from jax.experimental.pallas import tpu as pltpu


def _round_up(x, m):
    return ((x + m - 1) // m) * m


def highway_kernel(x_ref, w_ref, b_ref, o_ref):
    x = x_ref[...].astype(jnp.float32)

    # One fused matmul: [proj | gate] = x @ [Wp^T | Wg^T] + [bp | bg]
    # bf16 operands (f32 accumulate) keep the packed matmul off the MXU
    # critical path on every generation; bias add and everything after in f32.
    pg = jnp.dot(x_ref[...].astype(jnp.bfloat16), w_ref[...],
                 preferred_element_type=jnp.float32) + b_ref[...]
    d = pg.shape[-1] // 2
    x_proj = jnp.maximum(pg[:, :d], 0.0)   # relu        (VPU)
    x_gate = jax.nn.sigmoid(pg[:, d:])     # sigmoid exp (EUP slot, ~free)

    # Highway combine: g*p + (1-g)*x == x + g*(p - x)
    out = x + x_gate * (x_proj - x)

    # TODO(synk): dropout is identity here (eval-mode semantics); training-mode
    # dropout would draw a mask with pltpu.prng_seed / pltpu.prng_random_bits.
    o_ref[...] = out.astype(o_ref.dtype)


class HighwayParams(NamedTuple):
    w_cat: jax.Array   # (Ein, 2*Ein) bf16 fused [proj | gate] weight
    b_cat: jax.Array   # (1, 2*Ein)   f32 fused bias
    e: int             # original feature width
    pack: int          # rows folded per lane-dense row (1 if lane-padded path)
    ein: int           # lane-dense feature width (multiple of 128)


def prepare_highway_params(w_proj, b_proj, w_gate, b_gate):
    """Fold the two linears into one lane-dense fused weight.

    Call once per weight set (hoisted out of the per-forward path)."""
    E = w_proj.shape[0]
    if E < 128 and 128 % E == 0:
        pack, ein = 128 // E, 128
    else:
        pack, ein = 1, _round_up(E, 128)

    wp = w_proj.T.astype(jnp.float32)
    wg = w_gate.T.astype(jnp.float32)
    bp = b_proj.astype(jnp.float32)
    bg = b_gate.astype(jnp.float32)

    if pack > 1:
        eye = jnp.eye(pack, dtype=jnp.float32)
        wp = jnp.kron(eye, wp)              # (Ein, Ein) block-diagonal
        wg = jnp.kron(eye, wg)
        bp = jnp.tile(bp, pack)
        bg = jnp.tile(bg, pack)
    elif ein != E:
        pad = ein - E
        wp = jnp.pad(wp, ((0, pad), (0, pad)))   # zero K/N pad -> lane-dense
        wg = jnp.pad(wg, ((0, pad), (0, pad)))
        bp = jnp.pad(bp, (0, pad))
        bg = jnp.pad(bg, (0, pad))

    w_cat = jnp.concatenate([wp, wg], axis=1).astype(jnp.bfloat16)  # (Ein, 2*Ein)
    b_cat = jnp.concatenate([bp, bg]).reshape(1, 2 * ein)           # (1, 2*Ein) f32
    return HighwayParams(w_cat=w_cat, b_cat=b_cat, e=E, pack=pack, ein=ein)


def highway_forward(x, params: HighwayParams, *, block_rows=1024):
    orig_shape = x.shape
    E, pack, ein = params.e, params.pack, params.ein
    x2 = x.reshape(-1, E)
    M = x2.shape[0]

    if pack > 1:
        # Fold `pack` consecutive E-rows into one 128-lane row (row-major view).
        m_pad = _round_up(M, pack)
        if m_pad != M:
            # <= pack-1 rows: the only structurally required pad.
            x2 = jnp.pad(x2, ((0, m_pad - M), (0, 0)))
        mp = m_pad // pack
        x_in = x2.reshape(mp, ein)
    else:
        mp = M
        x_in = x2 if ein == E else jnp.pad(x2, ((0, 0), (0, ein - E)))

    # Row tile: big to amortize the ~0.35us/step overhead, but capped so the
    # grid keeps >=2 parallel steps (v7x megacore sharding).  Ragged last
    # block is handled by Pallas (masked stores), so no full-array pad.
    if mp >= 16:
        tm = min(block_rows, _round_up(pl.cdiv(mp, 2), 8))
    else:
        tm = mp                      # tiny input: one block == full array dims
    grid = (pl.cdiv(mp, tm),)

    itemsize = jnp.dtype(x.dtype).itemsize
    cost = pl.CostEstimate(
        flops=2 * mp * ein * 2 * ein,
        transcendentals=mp * ein,
        bytes_accessed=2 * mp * ein * itemsize        # x in + out
        + ein * 2 * ein * 2                           # bf16 fused weight
        + 2 * ein * 4,                                # f32 fused bias
    )

    # Per-step VMEM (double-buffered x/out tiles + resident fused weight +
    # f32 intermediates) is ~6 MiB at tm=1024, far under every generation's
    # scoped VMEM; set vmem_limit_bytes explicitly only if block_rows is
    # pushed past ~4096 on v7x.
    out = pl.pallas_call(
        highway_kernel,
        out_shape=jax.ShapeDtypeStruct((mp, ein), x.dtype),
        grid_spec=pltpu.PrefetchScalarGridSpec(
            num_scalar_prefetch=0,
            grid=grid,
            in_specs=[
                pl.BlockSpec((tm, ein), lambda i: (i, 0)),        # x rows (lane-dense)
                pl.BlockSpec((ein, 2 * ein), lambda i: (0, 0)),   # fused W (resident)
                pl.BlockSpec((1, 2 * ein), lambda i: (0, 0)),     # fused bias
            ],
            out_specs=pl.BlockSpec((tm, ein), lambda i: (i, 0)),
        ),
        compiler_params=pltpu.CompilerParams(
            dimension_semantics=("parallel",),
        ),
        cost_estimate=cost,
    )(x_in, params.w_cat, params.b_cat)

    if pack > 1:
        out = out.reshape(mp * pack, E)
        if mp * pack != M:
            out = out[:M]
    elif ein != E:
        out = out[:, :E]
    return out.reshape(orig_shape)


def highway_reference(x, w_proj, b_proj, w_gate, b_gate):
    x_proj = jax.nn.relu(x @ w_proj.T + b_proj)
    x_gate = jax.nn.sigmoid(x @ w_gate.T + b_gate)
    return x_gate * x_proj + (1.0 - x_gate) * x


if __name__ == "__main__":
    batch, seq, e_word = 2, 8, 32
    dropout_rate = 0.3  # eval-mode forward: dropout is identity

    key = jax.random.PRNGKey(0)
    kx, kwp, kbp, kwg, kbg = jax.random.split(key, 5)

    x = jax.random.normal(kx, (batch, seq, e_word), dtype=jnp.float32)

    # Kaiming-normal init for weights (fan_in = e_word, relu gain = sqrt(2)),
    # PyTorch-default uniform(-1/sqrt(fan_in), 1/sqrt(fan_in)) for biases.
    std = (2.0 / e_word) ** 0.5
    bound = 1.0 / (e_word ** 0.5)
    w_proj = std * jax.random.normal(kwp, (e_word, e_word), dtype=jnp.float32)
    b_proj = jax.random.uniform(kbp, (e_word,), minval=-bound, maxval=bound,
                                dtype=jnp.float32)
    w_gate = std * jax.random.normal(kwg, (e_word, e_word), dtype=jnp.float32)
    b_gate = jax.random.uniform(kbg, (e_word,), minval=-bound, maxval=bound,
                                dtype=jnp.float32)

    # Weight prep hoisted: runs once per weight set.
    params = prepare_highway_params(w_proj, b_proj, w_gate, b_gate)

    out = highway_forward(x, params)
    out = jax.block_until_ready(out)

    ref = highway_reference(x, w_proj, b_proj, w_gate, b_gate)
    assert out.shape == x.shape
    # bf16 MXU operands introduce ~1e-3 relative error on the linear outputs,
    # so the comparison tolerance is loosened accordingly.
    assert jnp.allclose(out, ref, atol=3e-2, rtol=3e-2), \
        float(jnp.max(jnp.abs(out - ref)))

    print("KERNEL_OK")
</pallas_src>

<mosaic_0001>
module attributes {stable_mosaic.version = 11 : i64} {
  func.func @highway_kernel(%arg0: i32, %arg1: memref<4x128xf32, #tpu.memory_space<vmem>>, %arg2: memref<128x256xbf16, #tpu.memory_space<vmem>>, %arg3: memref<1x256xf32, #tpu.memory_space<vmem>>, %arg4: memref<4x128xf32, #tpu.memory_space<vmem>>) attributes {dimension_semantics = [#tpu.dimension_semantics<parallel>], iteration_bounds = array<i64: 1>, scalar_prefetch = 0 : i64, scratch_operands = 0 : i64, tpu.core_type = #tpu.core_type<tc>, window_params = [{transform_indices = @transform_0, window_bounds = array<i64: 4, 128>}, {pipeline_mode = #tpu.pipeline_mode<synchronous>, transform_indices = @transform_1, window_bounds = array<i64: 128, 256>}, {pipeline_mode = #tpu.pipeline_mode<synchronous>, transform_indices = @transform_2, window_bounds = array<i64: 1, 256>}, {transform_indices = @transform_3, window_bounds = array<i64: 4, 128>}]} {
    %c0 = arith.constant 0 : index
    %c0_0 = arith.constant 0 : index
    %0 = vector.load %arg1[%c0, %c0_0] : memref<4x128xf32, #tpu.memory_space<vmem>>, vector<4x128xf32>
    %c0_1 = arith.constant 0 : index
    %c0_2 = arith.constant 0 : index
    %1 = vector.load %arg1[%c0_1, %c0_2] : memref<4x128xf32, #tpu.memory_space<vmem>>, vector<4x128xf32>
    %2 = arith.truncf %1 : vector<4x128xf32> to vector<4x128xbf16>
    %c0_3 = arith.constant 0 : index
    %c0_4 = arith.constant 0 : index
    %3 = vector.load %arg2[%c0_3, %c0_4] : memref<128x256xbf16, #tpu.memory_space<vmem>>, vector<128x256xbf16>
    %cst = arith.constant dense<0.000000e+00> : vector<4x256xf32>
    %4 = tpu.matmul %2, %3, %cst {dimension_numbers = #tpu.dot_dimension_numbers<[1], [0], [0], [1], [0, 0, 1, 1], [], []>} : vector<4x128xbf16>, vector<128x256xbf16>, vector<4x256xf32> -> vector<4x256xf32>
    %c0_5 = arith.constant 0 : index
    %c0_6 = arith.constant 0 : index
    %5 = vector.load %arg3[%c0_5, %c0_6] : memref<1x256xf32, #tpu.memory_space<vmem>>, vector<1x256xf32>
    %6 = vector.broadcast %5 : vector<1x256xf32> to vector<4x256xf32>
    %7 = arith.addf %4, %6 : vector<4x256xf32>
    %8 = vector.extract_strided_slice %7 {offsets = [0, 0], sizes = [4, 128], strides = [1, 1]} : vector<4x256xf32> to vector<4x128xf32>
    %cst_7 = arith.constant 0.000000e+00 : f32
    %9 = vector.broadcast %cst_7 : f32 to vector<4x128xf32>
    %10 = arith.maximumf %8, %9 : vector<4x128xf32>
    %11 = vector.extract_strided_slice %7 {offsets = [0, 128], sizes = [4, 128], strides = [1, 1]} : vector<4x256xf32> to vector<4x128xf32>
    %12 = arith.negf %11 : vector<4x128xf32>
    %13 = math.exp %12 : vector<4x128xf32>
    %cst_8 = arith.constant 1.000000e+00 : f32
    %14 = vector.broadcast %cst_8 : f32 to vector<4x128xf32>
    %15 = arith.addf %14, %13 : vector<4x128xf32>
    %16 = arith.divf %14, %15 : vector<4x128xf32>
    %17 = arith.subf %10, %0 : vector<4x128xf32>
    %18 = arith.mulf %16, %17 : vector<4x128xf32>
    %19 = arith.addf %0, %18 : vector<4x128xf32>
    %c0_9 = arith.constant 0 : index
    %c0_10 = arith.constant 0 : index
    %20 = vector.load %arg4[%c0_9, %c0_10] : memref<4x128xf32, #tpu.memory_space<vmem>>, vector<4x128xf32>
    tpu.vector_store %arg4[%c0_9, %c0_10], %19 {strides = array<i32>} : memref<4x128xf32, #tpu.memory_space<vmem>>, vector<4x128xf32>,
    return
  }
  func.func @transform_0(%arg0: i32) -> (i32, i32) {
    %c0_i32 = arith.constant 0 : i32
    %c0_i32_0 = arith.constant 0 : i32
    return %arg0, %c0_i32 : i32, i32
  }
  func.func @transform_1(%arg0: i32) -> (i32, i32) {
    %c0_i32 = arith.constant 0 : i32
    %c0_i32_0 = arith.constant 0 : i32
    %c0_i32_1 = arith.constant 0 : i32
    return %c0_i32, %c0_i32_0 : i32, i32
  }
  func.func @transform_2(%arg0: i32) -> (i32, i32) {
    %c0_i32 = arith.constant 0 : i32
    %c0_i32_0 = arith.constant 0 : i32
    %c0_i32_1 = arith.constant 0 : i32
    return %c0_i32, %c0_i32_0 : i32, i32
  }
  func.func @transform_3(%arg0: i32) -> (i32, i32) {
    %c0_i32 = arith.constant 0 : i32
    %c0_i32_0 = arith.constant 0 : i32
    return %arg0, %c0_i32 : i32, i32
  }
}

</mosaic_0001>

<bundles_post_ra>
// kernel: tpu_custom_call.1
= control target key start
LH: loop header
LB: loop body
LE: loop exit
PB: predicated region body
PF: predicated region fallthrough
CT: control target
= control target key end

     0   :  { %8 = vsyncpa [#allocation3], 0  ;;  %s461_s0 = inlined_call_operand.hbm [shape: f32[4,128], index: 0, kind: input, shape index: {}]   ;;  %s462_s1 = inlined_call_operand.hbm [shape: bf16[128,256], index: 1, kind: input, shape index: {}]   ;;  %s463_s2 = inlined_call_operand.hbm [shape: f32[1,256], index: 2, kind: input, shape index: {}]   ;;  %s464_s3 = inlined_call_operand.hbm [shape: f32[4,128], index: 3, kind: output, shape index: {}]  }
   0x1   :  { %9 = vsyncpa [#allocation6], 0  ;;  %s26_s14 = sshll.u32 %s462_s1, 4  ;;  %s27_s14 = int_to_ptr.hbm [resolvable:$true] %s26_s14 }
   0x2   :  { %10 = vsyncpa [#allocation4], 0  ;;  %s423_s15 = smov [#allocation5]   ;;  %s16_s19 = sshll.u32 %s461_s0, 4  ;;  %s17_s19 = int_to_ptr.hbm [resolvable:$true] %s16_s19 }
   0x3   :  { %s28_s16 = sshll.u32 %s423_s15, 4  ;;  %s424_s20 = smov 128   ;;  %s29_s16 = int_to_ptr.vmem [resolvable:$true] %s28_s16 }
   0x4   :  { %s425_s21 = smov 8   ;;  %s426_s22 = smov [#allocation2]  }
   0x5   :  { %34 = dma.hbm_to_vmem [thread:$0]  %s27_s14, 2048, %s29_s16, [#allocation6], %s424_s20, %s424_s20, %s425_s21  }
   0x6   :  { %s18_s23 = sshll.u32 %s426_s22, 4  ;;  %s40_s26 = sshll.u32 %s463_s2, 4  ;;  %s19_s23 = int_to_ptr.vmem [resolvable:$true] %s18_s23  ;;  %s41_s26 = int_to_ptr.hbm [resolvable:$true] %s40_s26 }
   0x7   :  { %21 = dma.hbm_to_vmem [thread:$0]  %s17_s19, 64, %s19_s23, [#allocation3]  }
   0x8   :  { %s427_s1 = smov [#allocation7]  }
   0x9   :  { %s42_s27 = sshll.u32 %s427_s1, 4  ;;  %s43_s27 = int_to_ptr.vmem [resolvable:$true] %s42_s27 }
   0xa   :  { %45 = dma.hbm_to_vmem [thread:$0]  %s41_s26, 32, %s43_s27, [#allocation6]  }
   0xb   :  { %417 = dma.done.wait [#allocation3], 64  }
   0xc   :  { %418 = vsyncadd [#allocation3], 4294967232 }
   0xd   :  { %419 = dma.done.wait [#allocation6], 2080  }
   0xe   :  { %420 = vsyncadd [#allocation6], 4294965216  ;;  %v309_v0 = vld [vmem:[#allocation5 + $0x74] sm:$0xf]  ;;  %v290_v1 = vld [vmem:[#allocation5 + $0x78] sm:$0xf0] }
   0xf   :  { %v307_v2 = vld [vmem:[#allocation5 + $0x64] sm:$0xf]  ;;  %v293_v3 = vor.u32 %v309_v0, %v290_v1  ;;  %v282_v4 = vld [vmem:[#allocation5 + $0x68] sm:$0xf0]  ;;  %v288_v5 = vld [vmem:[#allocation5 + $0x70] sm:$0xf] }
  0x10   :  { %v285_v6 = vor.u32 %v307_v2, %v282_v4  ;;  %v305_v7 = vld [vmem:[#allocation5 + $0x54] sm:$0xf]  ;;  %v310_v8 = vld [vmem:[#allocation5 + $0x74] sm:$0xf0]  ;;  %v274_v9 = vld [vmem:[#allocation5 + $0x58] sm:$0xf0] }
  0x11   :  { %175 = vmatpush.bf16.msra.mxu1 %v293_v3  ;;  %v289_v10 = vor.u32 %v310_v8, %v288_v5  ;;  %v280_v11 = vld [vmem:[#allocation5 + $0x60] sm:$0xf]  ;;  %v308_v12 = vld [vmem:[#allocation5 + $0x64] sm:$0xf0]  ;;  %v277_v14 = vor.u32 %v305_v7, %v274_v9  ;;  %v272_v15 = vld [vmem:[#allocation5 + $0x50] sm:$0xf] }
  0x12   :  { %v281_v13 = vor.u32 %v308_v12, %v280_v11  ;;  %v306_v16 = vld [vmem:[#allocation5 + $0x54] sm:$0xf0]  ;;  %v303_v17 = vld [vmem:[#allocation5 + $0x44] sm:$0xf]  ;;  %v266_v18 = vld [vmem:[#allocation5 + $0x48] sm:$0xf0] }
  0x13   :  { %162 = vmatpush.bf16.msra.mxu0 %v289_v10  ;;  %v273_v19 = vor.u32 %v306_v16, %v272_v15  ;;  %v269_v20 = vor.u32 %v303_v17, %v266_v18  ;;  %v264_v21 = vld [vmem:[#allocation5 + $0x40] sm:$0xf]  ;;  %v304_v22 = vld [vmem:[#allocation5 + $0x44] sm:$0xf0]  ;;  %v301_v23 = vld [vmem:[#allocation5 + $0x34] sm:$0xf] }
  0x14   :  { %v258_v24 = vld [vmem:[#allocation5 + $0x38] sm:$0xf0]  ;;  %v265_v25 = vor.u32 %v304_v22, %v264_v21  ;;  %v256_v27 = vld [vmem:[#allocation5 + $0x30] sm:$0xf]  ;;  %v302_v28 = vld [vmem:[#allocation5 + $0x34] sm:$0xf0] }
  0x15   :  { %176 = vmatpush.bf16.msra.mxu1 %v285_v6  ;;  %v261_v26 = vor.u32 %v301_v23, %v258_v24  ;;  %v299_v29 = vld [vmem:[#allocation5 + $0x24] sm:$0xf]  ;;  %v250_v30 = vld [vmem:[#allocation5 + $0x28] sm:$0xf0]  ;;  %v257_v31 = vor.u32 %v302_v28, %v256_v27  ;;  %v248_v33 = vld [vmem:[#allocation5 + $0x20] sm:$0xf] }
  0x16   :  { %v253_v32 = vor.u32 %v299_v29, %v250_v30  ;;  %v300_v34 = vld [vmem:[#allocation5 + $0x24] sm:$0xf0]  ;;  %v297_v35 = vld [vmem:[#allocation5 + $0x14] sm:$0xf]  ;;  %v242_v36 = vld [vmem:[#allocation5 + $0x18] sm:$0xf0] }
  0x17   :  { %163 = vmatpush.bf16.msra.mxu0 %v281_v13  ;;  %v249_v37 = vor.u32 %v300_v34, %v248_v33  ;;  %v245_v38 = vor.u32 %v297_v35, %v242_v36  ;;  %v240_v39 = vld [vmem:[#allocation5 + $0x10] sm:$0xf]  ;;  %v298_v40 = vld [vmem:[#allocation5 + $0x14] sm:$0xf0]  ;;  %v295_v41 = vld [vmem:[#allocation5 + $0x4] sm:$0xf] }
  0x18   :  { %v234_v42 = vld [vmem:[#allocation5 + $0x8] sm:$0xf0]  ;;  %v241_v43 = vor.u32 %v298_v40, %v240_v39  ;;  %v58_v45 = vld [vmem:[#allocation2] sm:$0xf]  ;;  %v232_v46 = vld [vmem:[#allocation5] sm:$0xf] }
  0x19   :  { %177 = vmatpush.bf16.msra.mxu1 %v277_v14  ;;  %v237_v44 = vor.u32 %v295_v41, %v234_v42  ;;  %v296_v47 = vld [vmem:[#allocation5 + $0x4] sm:$0xf0]  ;;  %v59_v48 = vpack.c.bf16 %v58_v45, %v58_v45  ;;  %v76_v50 = vld [vmem:[#allocation7] sm:$0x3]  ;;  %s428_s0 = smov [#allocation8]   ;;  %s219_s30 = sshll.u32 %s464_s3, 4  ;;  %s220_s30 = int_to_ptr.hbm [resolvable:$true] %s219_s30 }
  0x1a   :  { %v233_v49 = vor.u32 %v296_v47, %v232_v46  ;;  %v79_v51 = vperm.slane %v76_v50, 1  ;;  %v78_v60 = vperm.slane %v76_v50, 0  ;;  %s217_s2 = sshll.u32 %s428_s0, 4  ;;  %s218_s2 = int_to_ptr.vmem [resolvable:$true] %s217_s2 }
  0x1b   :  { %164 = vmatpush.bf16.msra.mxu0 %v273_v19 }
  0x1d   :  { %178 = vmatpush.bf16.msra.mxu1 %v269_v20 }
  0x1f   :  { %165 = vmatpush.bf16.msra.mxu0 %v265_v25 }
  0x21   :  { %179 = vmatpush.bf16.msra.mxu1 %v261_v26 }
  0x23   :  { %166 = vmatpush.bf16.msra.mxu0 %v257_v31 }
  0x25   :  { %180 = vmatpush.bf16.msra.mxu1 %v253_v32 }
  0x27   :  { %167 = vmatpush.bf16.msra.mxu0 %v249_v37 }
  0x29   :  { %181 = vmatpush.bf16.msra.mxu1 %v245_v38 }
  0x2b   :  { %168 = vmatpush.bf16.msra.mxu0 %v241_v43 }
  0x2d   :  { %182 = vmatpush.bf16.msra.mxu1 %v237_v44 }
  0x2f   :  { %169 = vmatpush.bf16.msra.mxu0 %v233_v49 }
  0x30   :  { %183 = vmatmul.bf16.vlgmr.msra.gmra.mxu1 %v59_v48 }
  0x32   :  { %170 = vmatmul.bf16.vlgmr.msra.gmra.mxu0 %v59_v48 }
  0xad   :  { %v184_v52 = vpop.f32.mrf.mxu1 }
  0xae   :  { %v185_v53 = vadd.f32 %v184_v52, %v79_v51 }
  0xaf   :  { %v171_v55 = vpop.f32.mrf.mxu0 }
  0xb0   :  { %v294_v54 = vmul.f32 -1.442695, %v185_v53  ;;  %v172_v61 = vadd.f32 %v171_v55, %v78_v60 }
  0xb2   :  { %317 = vpow2.f32 %v294_v54  ;;  %v188_v1 = vmax.f32 %v172_v61, 0.0 }
  0xb4   :  { %v208_v6 = vsub.f32 %v188_v1, %v58_v45 }
  0xb5   :  { %v186_v56 = vpop.f32.mrf.mxu1 }
  0xb7   :  { %v173_v58 = vpop.f32.mrf.mxu0 }
  0xb8   :  { %v318_v57 = vpop.eup %317 }
  0xb9   :  { %v192_v59 = vadd.f32 1.0, %v318_v57 }
  0xbb   :  { %319 = vrcp.f32 %v192_v59  ;;  %v204_v2 = vand.u32 2147483648, %v192_v59  ;;  %v202_v4 = vand.u32 2147483647, %v192_v59  ;;  %vm198_vm1 = vweird.f32 %v192_v59 }
  0xbd   :  { %v205_v7 = vor.u32 1.1754944e-38, %v204_v2  ;;  %vm203_vm3 = vcmp.eq.f32.partialorder %v202_v4, 8.507059e+37 }
  0xc1   :  { %v320_v62 = vpop.eup %319 }
  0xc2   :  { %v194_v63 = vmul.f32 %v320_v62, %v192_v59  ;;  %vm199_vm0 = vweird.f32 %v320_v62 }
  0xc3   :  { %vm200_vm2 = vmor %vm198_vm1, %vm199_vm0 }
  0xc4   :  { %v195_v0 = vsub.f32 1.0, %v194_v63 }
  0xc6   :  { %v196_v3 = vmul.f32 %v320_v62, %v195_v0 }
  0xc8   :  { %v197_v5 = vadd.f32 %v320_v62, %v196_v3 }
  0xca   :  { %v201_v8 = vsel %vm200_vm2, %v320_v62, %v197_v5 }
  0xcb   :  { %v206_v9 = vsel %vm203_vm3, %v205_v7, %v201_v8 }
  0xcc   :  { %v209_v10 = vmul.f32 %v208_v6, %v206_v9 }
  0xce   :  { %v210_v11 = vadd.f32 %v209_v10, %v58_v45 }
  0xd0   :  { %211 = vst [vmem:[#allocation8] sm:$0xf] %v210_v11 }
  0xd1   :  { %222 = dma.vmem_to_hbm [thread:$0]  %s218_s2, 64, %s220_s30, [#allocation4]  }
  0xd2   :  { %421 = dma.done.wait [#allocation4], 64  }
  0xd3   :  { %422 = vsyncadd [#allocation4], 4294967232 }
  0xd4   :  { %227 = vsyncpa [#allocation3], 1 }
  0xd5   :  { %228 = vsyncpa [#allocation6], 1 }
  0xd6   :  { %229 = vsyncpa [#allocation4], 1 }

</bundles_post_ra>
